<compile_context>
chip_gen: v5e
topology: v5e:2x2
jax: 0.10.0
libtpu: 0.0.40
codegen_flags: <defaults>
</compile_context>

<pallas_src>
import jax
import jax.numpy as jnp
from jax.experimental import pallas as pl
from jax.experimental.pallas import tpu as pltpu


_LANE = 128
_SUBLANE = 8
_TARGET_BLOCK_BYTES = 2 * 1024 * 1024  # per input block; x4 with dbl-buffered in+out


def _spatial_attention_kernel(w_ref, x_ref, o_ref):
    # w_ref: SMEM (2,) float32  -- (w_avg / C, w_max), 1/C pre-folded
    # x_ref: VMEM (TB, C, TS, 128)
    # o_ref: VMEM (TB, C, TS, 128)
    x = x_ref[...]

    # Channel reduction over axis=1 (non-minor): pure VPU work on full vregs.
    sum_c = jnp.sum(x, axis=1, keepdims=True, dtype=jnp.float32)   # (TB,1,TS,128)
    max_c = jnp.max(x, axis=1, keepdims=True).astype(jnp.float32)  # (TB,1,TS,128)

    # 1x1 conv over the 2-channel concat == weighted sum (no bias).
    att = w_ref[0] * sum_c + w_ref[1] * max_c

    # LeakyReLU(negative_slope=0.1)
    att = jnp.where(att >= 0, att, 0.1 * att)

    # Sigmoid (kept exact; the kernel is HBM-bandwidth-bound anyway).
    att = 1.0 / (1.0 + jnp.exp(-att))

    # Broadcast multiply over channels; stream x back out in its native dtype.
    o_ref[...] = (att.astype(x.dtype) * x).astype(o_ref.dtype)


def spatial_attention(x, conv_w):
    """
    x:      (B, C, H, W)  (NCHW, matching the PyTorch module)
    conv_w: (1, 2, 1, 1)  Conv2d(2, 1, (1,1), bias=False) weight
    returns (B, C, H, W)
    """
    B, C, H, W = x.shape
    HW = H * W
    itemsize = jnp.dtype(x.dtype).itemsize

    # ---- tiling: lane-dense (B, C, S, 128), spatial tiled in sublane rows ----
    S = -(-HW // _LANE)                       # number of 128-lane rows
    row_bytes = C * _LANE * itemsize          # bytes per spatial row per batch elem

    tile_s = max(1, _TARGET_BLOCK_BYTES // row_bytes)
    if tile_s >= S:
        tile_s = S                            # full extent (allowed by (8,128) rule)
    else:
        tile_s = max(_SUBLANE, (tile_s // _SUBLANE) * _SUBLANE)
        if tile_s >= S:
            tile_s = S
    s_pad = -(-S // tile_s) * tile_s
    hw_pad = s_pad * _LANE

    # Pack several batch elements per grid step when one element is tiny, so
    # each step amortizes the ~0.35us per-step overhead.
    tb = 1
    if tile_s == s_pad:
        block_bytes = C * tile_s * _LANE * itemsize
        for cand in range(B, 0, -1):
            if B % cand == 0 and cand * block_bytes <= _TARGET_BLOCK_BYTES:
                tb = cand
                break

    # ---- host-side layout + weight prep ----
    x2 = x.reshape(B, C, HW)
    if hw_pad != HW:
        x2 = jnp.pad(x2, ((0, 0), (0, 0), (0, hw_pad - HW)))
    x4 = x2.reshape(B, C, s_pad, _LANE)

    w = conv_w.reshape(2).astype(jnp.float32)
    w = jnp.array([w[0] / C, w[1]], dtype=jnp.float32)   # fold 1/C of the mean

    grid = (B // tb, s_pad // tile_s)
    blk = (tb, C, tile_s, _LANE)

    out = pl.pallas_call(
        _spatial_attention_kernel,
        out_shape=jax.ShapeDtypeStruct((B, C, s_pad, _LANE), x.dtype),
        grid_spec=pltpu.PrefetchScalarGridSpec(
            num_scalar_prefetch=0,
            grid=grid,
            in_specs=[
                pl.BlockSpec(memory_space=pltpu.SMEM),            # conv weights
                pl.BlockSpec(blk, lambda b, s: (b, 0, s, 0)),     # x block
            ],
            out_specs=pl.BlockSpec(blk, lambda b, s: (b, 0, s, 0)),
        ),
        compiler_params=pltpu.CompilerParams(
            dimension_semantics=("parallel", "parallel"),
            vmem_limit_bytes=32 * 1024 * 1024,
        ),
    )(w, x4)

    out = out.reshape(B, C, hw_pad)[:, :, :HW].reshape(B, C, H, W)
    return out


def _reference(x, conv_w):
    """Pure-JAX reference mirroring the PyTorch forward."""
    w = conv_w.reshape(2)
    avg_out = jnp.mean(x, axis=1, keepdims=True)
    max_out = jnp.max(x, axis=1, keepdims=True)
    att = w[0] * avg_out + w[1] * max_out
    att = jnp.where(att >= 0, att, 0.1 * att)
    att = jax.nn.sigmoid(att)
    return att * x


if __name__ == "__main__":
    key = jax.random.PRNGKey(0)
    k_x, k_w = jax.random.split(key)

    B, C, H, W = 2, 4, 16, 16
    x = jax.random.normal(k_x, (B, C, H, W), dtype=jnp.float32)

    # Deterministic init matching Conv2d(2, 1, (1,1), bias=False):
    # kaiming-uniform-ish, fan_in = 2 -> bound = 1/sqrt(2)
    bound = 1.0 / jnp.sqrt(2.0)
    conv_w = jax.random.uniform(k_w, (1, 2, 1, 1), dtype=jnp.float32,
                                minval=-bound, maxval=bound)

    out = spatial_attention(x, conv_w)
    out = jax.block_until_ready(out)

    ref = _reference(x, conv_w)
    assert out.shape == (B, C, H, W)
    assert jnp.allclose(out, ref, atol=1e-5, rtol=1e-5)

    print("KERNEL_OK")
</pallas_src>

<mosaic_0001>
module attributes {stable_mosaic.version = 11 : i64} {
  func.func @_spatial_attention_kernel(%arg0: i32, %arg1: i32, %arg2: memref<2xf32, #tpu.memory_space<smem>>, %arg3: memref<2x4x2x128xf32, #tpu.memory_space<vmem>>, %arg4: memref<2x4x2x128xf32, #tpu.memory_space<vmem>>) attributes {dimension_semantics = [#tpu.dimension_semantics<parallel>, #tpu.dimension_semantics<parallel>], iteration_bounds = array<i64: 1, 1>, scalar_prefetch = 0 : i64, scratch_operands = 0 : i64, tpu.core_type = #tpu.core_type<tc>, window_params = [{transform_indices = @transform_0, window_bounds = array<i64: 2>}, {transform_indices = @transform_1, window_bounds = array<i64: 2, 4, 2, 128>}, {transform_indices = @transform_2, window_bounds = array<i64: 2, 4, 2, 128>}]} {
    %c0 = arith.constant 0 : index
    %c0_0 = arith.constant 0 : index
    %c0_1 = arith.constant 0 : index
    %c0_2 = arith.constant 0 : index
    %0 = vector.load %arg3[%c0, %c0_0, %c0_1, %c0_2] : memref<2x4x2x128xf32, #tpu.memory_space<vmem>>, vector<2x4x2x128xf32>
    %cst = arith.constant dense<0.000000e+00> : vector<2x2x128xf32>
    %1 = vector.multi_reduction <add>, %0, %cst [1] : vector<2x4x2x128xf32> to vector<2x2x128xf32>
    %2 = vector.shape_cast %1 : vector<2x2x128xf32> to vector<2x1x2x128xf32>
    %cst_3 = arith.constant dense<0xFF800000> : vector<2x2x128xf32>
    %3 = vector.multi_reduction <maximumf>, %0, %cst_3 [1] : vector<2x4x2x128xf32> to vector<2x2x128xf32>
    %4 = vector.shape_cast %3 : vector<2x2x128xf32> to vector<2x1x2x128xf32>
    %c0_4 = arith.constant 0 : index
    %5 = memref.load %arg2[%c0_4] : memref<2xf32, #tpu.memory_space<smem>>
    %6 = vector.broadcast %5 : f32 to vector<2x1x2x128xf32>
    %7 = arith.mulf %6, %2 : vector<2x1x2x128xf32>
    %c1 = arith.constant 1 : index
    %8 = memref.load %arg2[%c1] : memref<2xf32, #tpu.memory_space<smem>>
    %9 = vector.broadcast %8 : f32 to vector<2x1x2x128xf32>
    %10 = arith.mulf %9, %4 : vector<2x1x2x128xf32>
    %11 = arith.addf %7, %10 : vector<2x1x2x128xf32>
    %cst_5 = arith.constant 0.000000e+00 : f32
    %12 = vector.broadcast %cst_5 : f32 to vector<2x1x2x128xf32>
    %13 = arith.cmpf oge, %11, %12 : vector<2x1x2x128xf32>
    %cst_6 = arith.constant 1.000000e-01 : f32
    %14 = vector.broadcast %cst_6 : f32 to vector<2x1x2x128xf32>
    %15 = arith.mulf %14, %11 : vector<2x1x2x128xf32>
    %16 = arith.select %13, %11, %15 : vector<2x1x2x128xi1>, vector<2x1x2x128xf32>
    %cst_7 = arith.constant 0.000000e+00 : f32
    %17 = vector.broadcast %cst_7 : f32 to vector<2x1x2x128xf32>
    %18 = arith.subf %17, %16 : vector<2x1x2x128xf32>
    %19 = math.exp %18 : vector<2x1x2x128xf32>
    %cst_8 = arith.constant 1.000000e+00 : f32
    %20 = vector.broadcast %cst_8 : f32 to vector<2x1x2x128xf32>
    %21 = arith.addf %20, %19 : vector<2x1x2x128xf32>
    %cst_9 = arith.constant 1.000000e+00 : f32
    %22 = vector.broadcast %cst_9 : f32 to vector<2x1x2x128xf32>
    %23 = arith.divf %22, %21 : vector<2x1x2x128xf32>
    %24 = vector.broadcast %23 : vector<2x1x2x128xf32> to vector<2x4x2x128xf32>
    %25 = arith.mulf %24, %0 : vector<2x4x2x128xf32>
    %c0_10 = arith.constant 0 : index
    %c0_11 = arith.constant 0 : index
    %c0_12 = arith.constant 0 : index
    %c0_13 = arith.constant 0 : index
    %26 = vector.load %arg4[%c0_10, %c0_11, %c0_12, %c0_13] : memref<2x4x2x128xf32, #tpu.memory_space<vmem>>, vector<2x4x2x128xf32>
    tpu.vector_store %arg4[%c0_10, %c0_11, %c0_12, %c0_13], %25 {strides = array<i32>} : memref<2x4x2x128xf32, #tpu.memory_space<vmem>>, vector<2x4x2x128xf32>,
    return
  }
  func.func @transform_0(%arg0: i32, %arg1: i32) -> i32 {
    %c0_i32 = arith.constant 0 : i32
    %c0_i32_0 = arith.constant 0 : i32
    return %c0_i32 : i32
  }
  func.func @transform_1(%arg0: i32, %arg1: i32) -> (i32, i32, i32, i32) {
    %c0_i32 = arith.constant 0 : i32
    %c0_i32_0 = arith.constant 0 : i32
    %c0_i32_1 = arith.constant 0 : i32
    return %arg0, %c0_i32, %arg1, %c0_i32_0 : i32, i32, i32, i32
  }
  func.func @transform_2(%arg0: i32, %arg1: i32) -> (i32, i32, i32, i32) {
    %c0_i32 = arith.constant 0 : i32
    %c0_i32_0 = arith.constant 0 : i32
    %c0_i32_1 = arith.constant 0 : i32
    return %arg0, %c0_i32, %arg1, %c0_i32_0 : i32, i32, i32, i32
  }
}

</mosaic_0001>

<bundles_post_ra>
// kernel: tpu_custom_call.1
= control target key start
LH: loop header
LB: loop body
LE: loop exit
PB: predicated region body
PF: predicated region fallthrough
CT: control target
= control target key end

     0   :  { %7 = vsyncpa [#allocation5], 0  ;;  %s345_s0 = inlined_call_operand.hbm [shape: f32[2], index: 0, kind: input, shape index: {}]   ;;  %s346_s1 = inlined_call_operand.hbm [shape: f32[2,4,2,128], index: 1, kind: input, shape index: {}]   ;;  %s347_s2 = inlined_call_operand.hbm [shape: f32[2,4,2,128], index: 2, kind: output, shape index: {}]  }
   0x1   :  { %8 = vsyncpa [#allocation3], 0 }
   0x2   :  { %9 = vsyncpa [#allocation4], 0  ;;  %s15_s11 = sshll.u32 %s345_s0, 4  ;;  %s23_s14 = sshll.u32 %s346_s1, 4  ;;  %s16_s11 = int_to_ptr.hbm [resolvable:$true] %s15_s11  ;;  %s24_s14 = int_to_ptr.hbm [resolvable:$true] %s23_s14 }
   0x3   :  { %s248_s15 = smov [#allocation2]   ;;  %s249_s16 = smov [#allocation6]  }
   0x4   :  { %18 = dma.hbm_to_smem %s16_s11, 16, %s248_s15, [#allocation5]  }
   0x5   :  { %s25_s17 = sshll.u32 %s249_s16, 4  ;;  %s250_s18 = smov 32   ;;  %s26_s17 = int_to_ptr.vmem [resolvable:$true] %s25_s17 }
   0x6   :  { %s251_s19 = smov 2  }
   0x7   :  { %31 = dma.hbm_to_vmem [thread:$0]  %s24_s14, 256, %s26_s17, [#allocation3], %s250_s18, %s250_s18, %s251_s19  }
   0x8   :  { %242 = dma.done.wait [#allocation5], 16  }
   0x9   :  { %243 = vsyncadd [#allocation5], 4294967280 }
   0xa   :  { %244 = dma.done.wait [#allocation3], 256  }
   0xb   :  { %245 = vsyncadd [#allocation3], 4294967040 }
   0xc   :  { %40 = sfence }
   0xd   :  { %v277_v0 = vld [vmem:[#allocation6] sm:$0x3]  ;;  %v279_v1 = vld [vmem:[#allocation6 + $0x2] sm:$0x3]  ;;  %v281_v2 = vld [vmem:[#allocation6 + $0x4] sm:$0x3] }
   0xe   :  { %v283_v3 = vld [vmem:[#allocation6 + $0x6] sm:$0x3]  ;;  %vm49_vm0 = vcmask 1041408   ;;  %s285_s0 = sld [smem:[#allocation2]]  ;;  %v303_v12 = vld [vmem:[#allocation6 + $0x8] sm:$0x3] }
   0xf   :  { %v50_v4 = vsel %vm49_vm0, %v277_v0, 0.0  ;;  %v51_v5 = vsel %vm49_vm0, %v279_v1, 0.0  ;;  %v53_v6 = vsel %vm49_vm0, %v281_v2, 0.0  ;;  %v55_v7 = vsel %vm49_vm0, %v283_v3, 0.0  ;;  %s295_s1 = sld [smem:[#allocation2 + $0x1]]  ;;  %s252_s20 = smov [#allocation7]  }
  0x10   :  { %v52_v8 = vadd.f32 %v51_v5, %v50_v4  ;;  %v64_v9 = vsel %vm49_vm0, %v277_v0, -inf  ;;  %v65_v10 = vsel %vm49_vm0, %v279_v1, -inf  ;;  %v66_v11 = vsel %vm49_vm0, %v281_v2, -inf  ;;  %v307_v15 = vld [vmem:[#allocation6 + $0xa] sm:$0x3]  ;;  %s152_s21 = sshll.u32 %s252_s20, 4  ;;  %s153_s21 = int_to_ptr.vmem [resolvable:$true] %s152_s21 }
  0x11   :  { %v67_v13 = vmax.f32 %v64_v9, %v66_v11  ;;  %v68_v14 = vsel %vm49_vm0, %v283_v3, -inf  ;;  %v309_v16 = vld [vmem:[#allocation6 + $0xc] sm:$0x3]  ;;  %v57_v17 = vsel %vm49_vm0, %v303_v12, 0.0  ;;  %v313_v20 = vld [vmem:[#allocation6 + $0xe] sm:$0x3] }
  0x12   :  { %v54_v18 = vadd.f32 %v53_v6, %v52_v8  ;;  %v69_v19 = vmax.f32 %v65_v10, %v68_v14  ;;  %v58_v21 = vsel %vm49_vm0, %v307_v15, 0.0  ;;  %v60_v22 = vsel %vm49_vm0, %v309_v16, 0.0  ;;  %s154_s24 = sshll.u32 %s347_s2, 4  ;;  %s155_s24 = int_to_ptr.hbm [resolvable:$true] %s154_s24 }
  0x13   :  { %v59_v23 = vadd.f32 %v58_v21, %v57_v17  ;;  %v62_v24 = vsel %vm49_vm0, %v313_v20, 0.0  ;;  %v71_v25 = vsel %vm49_vm0, %v303_v12, -inf  ;;  %v72_v26 = vsel %vm49_vm0, %v307_v15, -inf }
  0x14   :  { %v56_v27 = vadd.f32 %v55_v7, %v54_v18  ;;  %v70_v28 = vmax.f32 %v67_v13, %v69_v19  ;;  %v79_v29 = vstv %s285_s0  ;;  %v73_v30 = vsel %vm49_vm0, %v309_v16, -inf }
  0x15   :  { %v83_v31 = vstv %s295_s1  ;;  %v61_v32 = vadd.f32 %v60_v22, %v59_v23  ;;  %v74_v33 = vmax.f32 %v71_v25, %v73_v30  ;;  %v75_v34 = vsel %vm49_vm0, %v313_v20, -inf }
  0x16   :  { %v80_v35 = vmul.f32 %v79_v29, %v56_v27  ;;  %v84_v36 = vmul.f32 %v83_v31, %v70_v28  ;;  %v76_v37 = vmax.f32 %v72_v26, %v75_v34 }
  0x17   :  { %v63_v38 = vadd.f32 %v62_v24, %v61_v32 }
  0x18   :  { %v86_v39 = vadd.f32 %v84_v36, %v80_v35  ;;  %v77_v40 = vmax.f32 %v74_v33, %v76_v37 }
  0x19   :  { %v81_v41 = vmul.f32 %v79_v29, %v63_v38 }
  0x1a   :  { %vm88_vm1 = vcmp.ge.f32.partialorder %v86_v39, 0.0  ;;  %v90_v42 = vmul.f32 0.1, %v86_v39  ;;  %v85_v43 = vmul.f32 %v83_v31, %v77_v40 }
  0x1c   :  { %v92_v44 = vsel %vm88_vm1, %v86_v39, %v90_v42  ;;  %v87_v45 = vadd.f32 %v85_v43, %v81_v41 }
  0x1d   :  { %v94_v46 = vsub.f32 0.0, %v92_v44 }
  0x1e   :  { %vm89_vm2 = vcmp.ge.f32.partialorder %v87_v45, 0.0  ;;  %v91_v47 = vmul.f32 0.1, %v87_v45 }
  0x1f   :  { %v96_v48 = vmul.f32 1.442695, %v94_v46 }
  0x20   :  { %v93_v49 = vsel %vm89_vm2, %v87_v45, %v91_v47 }
  0x21   :  { %174 = vpow2.f32 %v96_v48  ;;  %v95_v50 = vsub.f32 0.0, %v93_v49 }
  0x23   :  { %v98_v51 = vmul.f32 1.442695, %v95_v50 }
  0x25   :  { %176 = vpow2.f32 %v98_v51 }
  0x27   :  { %v175_v52 = vpop.eup %174 }
  0x28   :  { %v100_v53 = vadd.f32 1.0, %v175_v52 }
  0x2a   :  { %178 = vrcp.f32 %v100_v53  ;;  %v113_v58 = vand.u32 2147483648, %v100_v53  ;;  %vm107_vm3 = vweird.f32 %v100_v53  ;;  %v111_v60 = vand.u32 2147483647, %v100_v53 }
  0x2b   :  { %v177_v54 = vpop.eup %176 }
  0x2c   :  { %v101_v55 = vadd.f32 1.0, %v177_v54  ;;  %v114_v4 = vor.u32 1.1754944e-38, %v113_v58  ;;  %vm112_vm6 = vcmp.eq.f32.partialorder %v111_v60, 8.507059e+37 }
  0x2e   :  { %180 = vrcp.f32 %v101_v55  ;;  %v128_v7 = vand.u32 2147483648, %v101_v55  ;;  %vm122_vm7 = vweird.f32 %v101_v55  ;;  %v126_v8 = vand.u32 2147483647, %v101_v55 }
  0x30   :  { %v179_v56 = vpop.eup %178  ;;  %v129_v18 = vor.u32 1.1754944e-38, %v128_v7  ;;  %vm127_vm10 = vcmp.eq.f32.partialorder %v126_v8, 8.507059e+37 }
  0x31   :  { %v103_v57 = vmul.f32 %v179_v56, %v100_v53  ;;  %vm108_vm4 = vweird.f32 %v179_v56 }
  0x32   :  { %vm109_vm5 = vmor %vm107_vm3, %vm108_vm4 }
  0x33   :  { %v104_v59 = vsub.f32 1.0, %v103_v57 }
  0x34   :  { %v181_v61 = vpop.eup %180 }
  0x35   :  { %v105_v62 = vmul.f32 %v179_v56, %v104_v59  ;;  %v118_v63 = vmul.f32 %v181_v61, %v101_v55  ;;  %vm123_vm8 = vweird.f32 %v181_v61 }
  0x36   :  { %vm124_vm9 = vmor %vm122_vm7, %vm123_vm8 }
  0x37   :  { %v106_v5 = vadd.f32 %v179_v56, %v105_v62  ;;  %v119_v6 = vsub.f32 1.0, %v118_v63 }
  0x39   :  { %v110_v9 = vsel %vm109_vm5, %v179_v56, %v106_v5  ;;  %v120_v10 = vmul.f32 %v181_v61, %v119_v6 }
  0x3a   :  { %v115_v11 = vsel %vm112_vm6, %v114_v4, %v110_v9 }
  0x3b   :  { %v132_v13 = vmul.f32 %v115_v11, %v277_v0  ;;  %v133_v14 = vmul.f32 %v115_v11, %v279_v1  ;;  %v134_v17 = vmul.f32 %v115_v11, %v281_v2  ;;  %v135_v19 = vmul.f32 %v115_v11, %v283_v3 }
  0x3c   :  { %v121_v21 = vadd.f32 %v181_v61, %v120_v10 }
  0x3d   :  { %140 = vst [vmem:[#allocation7] sm:$0x3] %v132_v13 }
  0x3e   :  { %141 = vst [vmem:[#allocation7 + $0x2] sm:$0x3] %v133_v14  ;;  %v125_v22 = vsel %vm124_vm9, %v181_v61, %v121_v21 }
  0x3f   :  { %142 = vst [vmem:[#allocation7 + $0x4] sm:$0x3] %v134_v17  ;;  %v130_v23 = vsel %vm127_vm10, %v129_v18, %v125_v22 }
  0x40   :  { %143 = vst [vmem:[#allocation7 + $0x6] sm:$0x3] %v135_v19  ;;  %v136_v24 = vmul.f32 %v130_v23, %v303_v12  ;;  %v137_v0 = vmul.f32 %v130_v23, %v307_v15  ;;  %v138_v1 = vmul.f32 %v130_v23, %v309_v16  ;;  %v139_v2 = vmul.f32 %v130_v23, %v313_v20 }
  0x42   :  { %144 = vst [vmem:[#allocation7 + $0x8] sm:$0x3] %v136_v24 }
  0x43   :  { %145 = vst [vmem:[#allocation7 + $0xa] sm:$0x3] %v137_v0 }
  0x44   :  { %146 = vst [vmem:[#allocation7 + $0xc] sm:$0x3] %v138_v1 }
  0x45   :  { %147 = vst [vmem:[#allocation7 + $0xe] sm:$0x3] %v139_v2 }
  0x46   :  { %160 = dma.vmem_to_hbm [thread:$0]  %s153_s21, 256, %s155_s24, [#allocation4], %s250_s18, %s250_s18, %s251_s19  }
  0x47   :  { %246 = dma.done.wait [#allocation4], 256  }
  0x48   :  { %247 = vsyncadd [#allocation4], 4294967040 }
  0x49   :  { %165 = vsyncpa [#allocation3], 1 }
  0x4a   :  { %166 = vsyncpa [#allocation4], 1 }
  0x4b   :  { %167 = vsyncpa [#allocation5], 1 }

</bundles_post_ra>
